<compile_context>
chip_gen: v5e
topology: v5e:2x2
jax: 0.10.0
libtpu: 0.0.40
codegen_flags: <defaults>
</compile_context>

<pallas_src>
import jax
import jax.numpy as jnp
from jax import lax
from jax.experimental import pallas as pl
from jax.experimental.pallas import tpu as pltpu

_LANE = 128


def _round_up(a, b):
    return ((a + b - 1) // b) * b


def _num_tensorcores():
    """TensorCores addressable by one pallas_call (megacore 'parallel' split)."""
    try:
        kind = jax.devices()[0].device_kind.lower()
    except Exception:
        return 1
    # v7x (and v4 megacore) expose 2 TensorCores to one program; v5e/v6e have 1.
    return 2 if ("v7" in kind or "v4" in kind) else 1


def _default_tile_bytes():
    try:
        kind = jax.devices()[0].device_kind.lower()
    except Exception:
        kind = ""
    # v7x: 3.2 TB/s HBM halves per-step DMA time, so use bigger tiles there.
    return (4 << 20) if "v7" in kind else (2 << 20)


def _make_mse_kernel(row_tile, steps, valid_rows, needs_mask):
    def kernel(x_ref, t_ref, out_ref, acc_ref):
        i = pl.program_id(1)

        @pl.when(i == 0)
        def _():
            acc_ref[...] = jnp.zeros_like(acc_ref)

        # Load in native dtype (halves HBM traffic for bf16), accumulate in f32.
        d = x_ref[...].astype(jnp.float32) - t_ref[...].astype(jnp.float32)
        dd = d * d
        if needs_mask:
            # Zero rows past the true row count (covers the partial trailing
            # tile and any clamped/duplicated steps of an uneven shard split).
            g = pl.program_id(0) * steps + i            # un-clamped global tile idx
            valid = valid_rows - g * row_tile
            rid = lax.broadcasted_iota(jnp.int32, (row_tile, _LANE), 0)
            dd = jnp.where(rid < valid, dd, 0.0)
        # Reduce the tile to a single-vreg (8, 128) partial: same VALU add count
        # as a full-tile accumulator but only one vreg of accumulator RMW.
        acc_ref[...] += dd.reshape(row_tile // 8, 8, _LANE).sum(axis=0)

        @pl.when(i == pl.num_programs(1) - 1)
        def _():
            out_ref[0] = acc_ref[...]                   # trivial epilogue, no XLU

    return kernel


def content_loss(x, target, *, tile_bytes=None, num_shards=None,
                 small_elems=1 << 18, force_pallas=False):
    """Returns (x, loss) where loss = mean((x - target)^2) over all elements."""
    assert x.shape == target.shape, "x and target must have the same shape"
    n_elems = x.size
    xf = x.reshape(-1)
    tf = target.reshape(-1)

    def _jnp_mse(a, b):
        return jnp.mean((a.astype(jnp.float32) - b.astype(jnp.float32)) ** 2)

    itemsize = jnp.dtype(x.dtype).itemsize
    sub_mult = max(8, 32 // itemsize)     # f32 -> 8, bf16 -> 16, int8/fp8 -> 32
    rows = n_elems // _LANE               # lane-aligned prefix rows

    # Fast path: small inputs are cheaper as one fused XLA reduction.
    if (not force_pallas and n_elems < small_elems) or rows < sub_mult:
        return x, _jnp_mse(xf, tf)

    if tile_bytes is None:
        tile_bytes = _default_tile_bytes()
    if num_shards is None:
        num_shards = _num_tensorcores()

    # Byte-budgeted tile height, floored to the dtype's sublane multiple and
    # capped so the block never exceeds the array (<= rows).
    budget_rows = max(sub_mult,
                      (tile_bytes // (_LANE * itemsize)) // sub_mult * sub_mult)
    row_tile = min(budget_rows, (rows // sub_mult) * sub_mult)
    total_tiles = pl.cdiv(rows, row_tile)
    shards = num_shards if total_tiles >= num_shards else 1
    steps = pl.cdiv(total_tiles, shards)
    covered_rows = shards * steps * row_tile
    needs_mask = covered_rows != rows
    last_tile = total_tiles - 1

    if rows * _LANE == n_elems:
        x2d = xf.reshape(rows, _LANE)                       # free bitcast reshape
        t2d = tf.reshape(rows, _LANE)
    else:
        # Only when size % 128 != 0: slice off the <128-elem lane remainder.
        x2d = xf[: rows * _LANE].reshape(rows, _LANE)
        t2d = tf[: rows * _LANE].reshape(rows, _LANE)

    if shards * steps == total_tiles:
        def in_map(c, i):
            return (c * steps + i, 0)
    else:
        # Uneven shard split: clamp the extra grid steps onto the last valid
        # tile (their contribution is zeroed by the in-kernel mask).
        def in_map(c, i):
            return (jnp.minimum(c * steps + i, last_tile), 0)

    kernel = _make_mse_kernel(row_tile, steps, rows, needs_mask)

    partials = pl.pallas_call(
        kernel,
        out_shape=jax.ShapeDtypeStruct((shards, 8, _LANE), jnp.float32),
        grid_spec=pltpu.PrefetchScalarGridSpec(
            num_scalar_prefetch=0,
            grid=(shards, steps),
            in_specs=[pl.BlockSpec((row_tile, _LANE), in_map),
                      pl.BlockSpec((row_tile, _LANE), in_map)],
            out_specs=pl.BlockSpec((1, 8, _LANE), lambda c, i: (c, 0, 0)),
            scratch_shapes=[pltpu.VMEM((8, _LANE), jnp.float32)],
        ),
        compiler_params=pltpu.CompilerParams(
            dimension_semantics=("parallel", "arbitrary"),
        ),
        cost_estimate=pl.CostEstimate(
            flops=3 * n_elems,
            transcendentals=0,
            bytes_accessed=2 * rows * _LANE * itemsize + shards * 8 * _LANE * 4,
        ),
    )(x2d, t2d)

    total = jnp.sum(partials)
    rem = n_elems - rows * _LANE
    if rem:
        xt = xf[rows * _LANE:].astype(jnp.float32)
        tt = tf[rows * _LANE:].astype(jnp.float32)
        total = total + jnp.sum((xt - tt) ** 2)
    loss = total / jnp.float32(n_elems)
    # Module's forward returns x unchanged (loss stored as a side attribute in
    # PyTorch; returned functionally here).
    return x, loss


if __name__ == "__main__":
    key = jax.random.PRNGKey(0)
    k1, k2, k3, k4, k5, k6 = jax.random.split(key, 6)

    def ref_mse(a, b):
        return jnp.mean((a.astype(jnp.float32) - b.astype(jnp.float32)) ** 2)

    # 1) Small conv feature map (lane-aligned), forced through the Pallas path.
    x1 = jax.random.normal(k1, (2, 4, 16, 16), dtype=jnp.float32)
    t1 = jax.random.normal(k2, (2, 4, 16, 16), dtype=jnp.float32)
    out1, loss1 = content_loss(x1, t1, force_pallas=True)
    jax.block_until_ready((out1, loss1))
    assert jnp.array_equal(out1, x1)                       # passthrough
    assert jnp.allclose(loss1, ref_mse(x1, t1), rtol=1e-5, atol=1e-6)

    # 2) Non-aligned shape: exercises partial-tile mask + lane-remainder tail.
    x2 = jax.random.normal(k3, (3, 5, 17, 19), dtype=jnp.float32)
    t2 = jax.random.normal(k4, (3, 5, 17, 19), dtype=jnp.float32)
    out2, loss2 = content_loss(x2, t2, force_pallas=True)
    jax.block_until_ready((out2, loss2))
    assert jnp.allclose(loss2, ref_mse(x2, t2), rtol=1e-5, atol=1e-6)

    # 3) bf16 inputs through the Pallas path (f32 accumulation in-kernel).
    x3 = jax.random.normal(k5, (2, 8, 32, 32), dtype=jnp.bfloat16)
    t3 = jax.random.normal(k6, (2, 8, 32, 32), dtype=jnp.bfloat16)
    out3, loss3 = content_loss(x3, t3, force_pallas=True)
    jax.block_until_ready((out3, loss3))
    assert jnp.allclose(loss3, ref_mse(x3, t3), rtol=1e-4, atol=1e-5)

    # 4) Auto path for small inputs (fused XLA fast path, no kernel launch).
    out4, loss4 = content_loss(x1, t1)
    jax.block_until_ready((out4, loss4))
    assert jnp.allclose(loss4, loss1, rtol=1e-5, atol=1e-6)

    print("KERNEL_OK")
</pallas_src>

<mosaic_0001>
module attributes {stable_mosaic.version = 11 : i64} {
  func.func @kernel(%arg0: i32, %arg1: i32, %arg2: memref<16x128xf32, #tpu.memory_space<vmem>>, %arg3: memref<16x128xf32, #tpu.memory_space<vmem>>, %arg4: memref<1x8x128xf32, #tpu.memory_space<vmem>>, %arg5: memref<8x128xf32, #tpu.memory_space<vmem>>) attributes {dimension_semantics = [#tpu.dimension_semantics<parallel>, #tpu.dimension_semantics<arbitrary>], iteration_bounds = array<i64: 1, 1>, scalar_prefetch = 0 : i64, scratch_operands = 1 : i64, tpu.core_type = #tpu.core_type<tc>, window_params = [{transform_indices = @transform_0, window_bounds = array<i64: 16, 128>}, {transform_indices = @transform_1, window_bounds = array<i64: 16, 128>}, {transform_indices = @transform_2, window_bounds = array<i64: 1, 8, 128>}]} {
    %c0_i32 = arith.constant 0 : i32
    %0 = arith.cmpi eq, %arg1, %c0_i32 : i32
    %1 = arith.extui %0 : i1 to i32
    %c0_i32_0 = arith.constant 0 : i32
    %2 = arith.cmpi ne, %1, %c0_i32_0 : i32
    scf.if %2 {
      %cst_10 = arith.constant 0.000000e+00 : f32
      %15 = vector.broadcast %cst_10 : f32 to vector<8x128xf32>
      %c0_11 = arith.constant 0 : index
      %c0_12 = arith.constant 0 : index
      %16 = vector.load %arg5[%c0_11, %c0_12] : memref<8x128xf32, #tpu.memory_space<vmem>>, vector<8x128xf32>
      tpu.vector_store %arg5[%c0_11, %c0_12], %15 {strides = array<i32>} : memref<8x128xf32, #tpu.memory_space<vmem>>, vector<8x128xf32>,
    } else {
    }
    %c0 = arith.constant 0 : index
    %c0_1 = arith.constant 0 : index
    %3 = vector.load %arg2[%c0, %c0_1] : memref<16x128xf32, #tpu.memory_space<vmem>>, vector<16x128xf32>
    %c0_2 = arith.constant 0 : index
    %c0_3 = arith.constant 0 : index
    %4 = vector.load %arg3[%c0_2, %c0_3] : memref<16x128xf32, #tpu.memory_space<vmem>>, vector<16x128xf32>
    %5 = arith.subf %3, %4 : vector<16x128xf32>
    %6 = arith.mulf %5, %5 : vector<16x128xf32>
    %c0_4 = arith.constant 0 : index
    %c0_5 = arith.constant 0 : index
    %7 = vector.load %arg5[%c0_4, %c0_5] : memref<8x128xf32, #tpu.memory_space<vmem>>, vector<8x128xf32>
    %8 = vector.shape_cast %6 : vector<16x128xf32> to vector<2x8x128xf32>
    %cst = arith.constant dense<0.000000e+00> : vector<8x128xf32>
    %9 = vector.multi_reduction <add>, %8, %cst [0] : vector<2x8x128xf32> to vector<8x128xf32>
    %10 = arith.addf %7, %9 : vector<8x128xf32>
    %c0_6 = arith.constant 0 : index
    %c0_7 = arith.constant 0 : index
    %11 = vector.load %arg5[%c0_6, %c0_7] : memref<8x128xf32, #tpu.memory_space<vmem>>, vector<8x128xf32>
    tpu.vector_store %arg5[%c0_6, %c0_7], %10 {strides = array<i32>} : memref<8x128xf32, #tpu.memory_space<vmem>>, vector<8x128xf32>,
    %c0_i32_8 = arith.constant 0 : i32
    %12 = arith.cmpi eq, %arg1, %c0_i32_8 : i32
    %13 = arith.extui %12 : i1 to i32
    %c0_i32_9 = arith.constant 0 : i32
    %14 = arith.cmpi ne, %13, %c0_i32_9 : i32
    scf.if %14 {
      %c0_10 = arith.constant 0 : index
      %c0_11 = arith.constant 0 : index
      %15 = vector.load %arg5[%c0_10, %c0_11] : memref<8x128xf32, #tpu.memory_space<vmem>>, vector<8x128xf32>
      %c0_12 = arith.constant 0 : index
      %c0_13 = arith.constant 0 : index
      %c0_14 = arith.constant 0 : index
      %16 = vector.load %arg4[%c0_12, %c0_13, %c0_14] : memref<1x8x128xf32, #tpu.memory_space<vmem>>, vector<1x8x128xf32>
      %17 = vector.shape_cast %16 : vector<1x8x128xf32> to vector<8x128xf32>
      %18 = vector.shape_cast %15 : vector<8x128xf32> to vector<1x8x128xf32>
      tpu.vector_store %arg4[%c0_12, %c0_13, %c0_14], %18 {strides = array<i32>} : memref<1x8x128xf32, #tpu.memory_space<vmem>>, vector<1x8x128xf32>,
    } else {
    }
    return
  }
  func.func @transform_0(%arg0: i32, %arg1: i32) -> (i32, i32) {
    %c1_i32 = arith.constant 1 : i32
    %0 = arith.muli %arg0, %c1_i32 : i32
    %1 = arith.addi %0, %arg1 : i32
    %c0_i32 = arith.constant 0 : i32
    %c0_i32_0 = arith.constant 0 : i32
    return %1, %c0_i32 : i32, i32
  }
  func.func @transform_1(%arg0: i32, %arg1: i32) -> (i32, i32) {
    %c1_i32 = arith.constant 1 : i32
    %0 = arith.muli %arg0, %c1_i32 : i32
    %1 = arith.addi %0, %arg1 : i32
    %c0_i32 = arith.constant 0 : i32
    %c0_i32_0 = arith.constant 0 : i32
    return %1, %c0_i32 : i32, i32
  }
  func.func @transform_2(%arg0: i32, %arg1: i32) -> (i32, i32, i32) {
    %c0_i32 = arith.constant 0 : i32
    %c0_i32_0 = arith.constant 0 : i32
    %c0_i32_1 = arith.constant 0 : i32
    return %arg0, %c0_i32, %c0_i32_0 : i32, i32, i32
  }
}

</mosaic_0001>

<bundles_post_ra>
// kernel: tpu_custom_call.1
= control target key start
LH: loop header
LB: loop body
LE: loop exit
PB: predicated region body
PF: predicated region fallthrough
CT: control target
= control target key end

     0   :  { %7 = vsyncpa [#allocation4], 0  ;;  %s208_s0 = inlined_call_operand.hbm [shape: f32[16,128], index: 0, kind: input, shape index: {}]   ;;  %s209_s1 = inlined_call_operand.hbm [shape: f32[16,128], index: 1, kind: input, shape index: {}]   ;;  %s210_s2 = inlined_call_operand.hbm [shape: f32[1,8,128], index: 2, kind: output, shape index: {}]  }
   0x1   :  { %8 = vsyncpa [#allocation7], 0 }
   0x2   :  { %9 = vsyncpa [#allocation5], 0  ;;  %s18_s11 = sshll.u32 %s208_s0, 4  ;;  %s179_s12 = smov [#allocation3]   ;;  %s19_s11 = int_to_ptr.hbm [resolvable:$true] %s18_s11 }
   0x3   :  { %s20_s13 = sshll.u32 %s179_s12, 4  ;;  %s35_s16 = sshll.u32 %s209_s1, 4  ;;  %s21_s13 = int_to_ptr.vmem [resolvable:$true] %s20_s13  ;;  %s36_s16 = int_to_ptr.hbm [resolvable:$true] %s35_s16 }
   0x4   :  { %s180_s17 = smov 128   ;;  %s181_s18 = smov 8  }
   0x5   :  { %26 = dma.hbm_to_vmem [thread:$0]  %s19_s11, 256, %s21_s13, [#allocation4], %s180_s17, %s180_s17, %s181_s18  }
   0x6   :  { %s182_s19 = smov [#allocation6]  }
   0x7   :  { %s37_s20 = sshll.u32 %s182_s19, 4  ;;  %s38_s20 = int_to_ptr.vmem [resolvable:$true] %s37_s20 }
   0x8   :  { %43 = dma.hbm_to_vmem [thread:$0]  %s36_s16, 256, %s38_s20, [#allocation7], %s180_s17, %s180_s17, %s181_s18  }
   0x9   :  { %173 = dma.done.wait [#allocation4], 256  }
   0xa   :  { %174 = vsyncadd [#allocation4], 4294967040 }
   0xb   :  { %175 = dma.done.wait [#allocation7], 256  }
   0xc   :  { %176 = vsyncadd [#allocation7], 4294967040  ;;  %v61_v0 = vld [vmem:[#allocation3] sm:$0xff]  ;;  %v62_v1 = vld [vmem:[#allocation3 + $0x8] sm:$0xff]  ;;  %s183_s0 = smov [#allocation8]   ;;  %s85_s23 = sshll.u32 %s210_s2, 4  ;;  %s86_s23 = int_to_ptr.hbm [resolvable:$true] %s85_s23 }
   0xd   :  { %v63_v2 = vld [vmem:[#allocation6] sm:$0xff]  ;;  %v64_v3 = vld [vmem:[#allocation6 + $0x8] sm:$0xff]  ;;  %s83_s1 = sshll.u32 %s183_s0, 4  ;;  %s84_s1 = int_to_ptr.vmem [resolvable:$true] %s83_s1 }
   0xe   :  { %v65_v4 = vsub.f32 %v61_v0, %v63_v2  ;;  %v66_v5 = vsub.f32 %v62_v1, %v64_v3 }
  0x10   :  { %v67_v6 = vmul.f32 %v65_v4, %v65_v4  ;;  %v68_v7 = vmul.f32 %v66_v5, %v66_v5 }
  0x12   :  { %v70_v8 = vadd.f32 %v68_v7, %v67_v6 }
  0x14   :  { %77 = vst [vmem:[#allocation8] sm:$0xff] %v70_v8 }
  0x15   :  { %88 = dma.vmem_to_hbm [thread:$0]  %s84_s1, 128, %s86_s23, [#allocation5]  }
  0x16   :  { %177 = dma.done.wait [#allocation5], 128  }
  0x17   :  { %178 = vsyncadd [#allocation5], 4294967168 }
  0x18   :  { %93 = vsyncpa [#allocation4], 1 }
  0x19   :  { %94 = vsyncpa [#allocation7], 1 }
  0x1a   :  { %95 = vsyncpa [#allocation5], 1 }

</bundles_post_ra>
